<compile_context>
chip_gen: v7x
topology: tpu7x:2x2x1
jax: 0.10.0
libtpu: 0.0.40
codegen_flags: <defaults>
</compile_context>

<pallas_src>
import functools

import jax
import jax.numpy as jnp
from jax.experimental import pallas as pl
from jax.experimental.pallas import tpu as pltpu

BN_EPS = 1e-5
NEG_SLOPE = 0.1
COMPUTE_DTYPE = jnp.bfloat16      # MXU-native operand/activation dtype
P2_TILE_ROWS = 2048               # pass-2 elementwise row tile (lane-dense)


def _detect_vmem_limit():
    """Per-generation VMEM budget: ~96 MiB on 128-MiB chips (v5e/v6e), ~48 MiB on v7x."""
    cap = 64 * 1024 * 1024
    try:
        info = pltpu.get_tpu_info()
        cap = int(getattr(info, "vmem_capacity_bytes", cap) or cap)
    except Exception:
        pass
    return int(min(cap * 3 // 4, 100 * 1024 * 1024))


VMEM_LIMIT = _detect_vmem_limit()
# Path A is used whenever the per-layer fused working set fits this budget.
FUSED_VMEM_BUDGET = min(VMEM_LIMIT // 3, 20 * 1024 * 1024)


def _round_up(x, m):
    return (x + m - 1) // m * m


# ----------------------------------------------------------------------------
# Path A kernels: fused matmul + train-mode BN (single-pass stats) + LeakyReLU
# Blocks: patches (M, Kc) full, weights (Kc, TC) tiled over Cout,
# gamma/beta (1, TC), output (M, TC).
# ----------------------------------------------------------------------------
def _fused_kernel(m_real, x_ref, w_ref, g_ref, b_ref, o_ref):
    acc = jnp.dot(x_ref[...], w_ref[...], preferred_element_type=jnp.float32)
    inv_m = 1.0 / m_real
    mean = jnp.sum(acc, axis=0, keepdims=True) * inv_m
    var = jnp.maximum(
        jnp.sum(acc * acc, axis=0, keepdims=True) * inv_m - mean * mean, 0.0)
    y = (acc - mean) * jax.lax.rsqrt(var + BN_EPS)
    y = y * g_ref[...] + b_ref[...]
    y = jnp.where(y >= 0, y, NEG_SLOPE * y)
    o_ref[...] = y.astype(o_ref.dtype)


def _fused_res_kernel(m_real, x_ref, w_ref, g_ref, b_ref, r_ref, o_ref):
    acc = jnp.dot(x_ref[...], w_ref[...], preferred_element_type=jnp.float32)
    inv_m = 1.0 / m_real
    mean = jnp.sum(acc, axis=0, keepdims=True) * inv_m
    var = jnp.maximum(
        jnp.sum(acc * acc, axis=0, keepdims=True) * inv_m - mean * mean, 0.0)
    y = (acc - mean) * jax.lax.rsqrt(var + BN_EPS)
    y = y * g_ref[...] + b_ref[...]
    y = jnp.where(y >= 0, y, NEG_SLOPE * y)
    o_ref[...] = (r_ref[...].astype(jnp.float32) + y).astype(o_ref.dtype)


# ----------------------------------------------------------------------------
# Path B, pass 1 kernels.  Grid = (cout tiles [parallel],
#                                  core split   [parallel],
#                                  output rows  [arbitrary, last]).
# Every grid step produces one full output image-row: z block (1, Wo, TC) plus
# per-channel sum / sum-of-squares accumulated into stats (1, 2, TC).
# ----------------------------------------------------------------------------
def _p1_matmul_kernel(x_ref, w_ref, z_ref, stats_ref):
    # x_ref: (1, Wo, K) bf16 ; w_ref: (K, TC) bf16
    acc = jnp.dot(x_ref[0], w_ref[...], preferred_element_type=jnp.float32)

    @pl.when(pl.program_id(2) == 0)
    def _():
        stats_ref[...] = jnp.zeros(stats_ref.shape, stats_ref.dtype)

    stats_ref[0, 0:1, :] += jnp.sum(acc, axis=0, keepdims=True)
    stats_ref[0, 1:2, :] += jnp.sum(acc * acc, axis=0, keepdims=True)
    z_ref[0] = acc.astype(z_ref.dtype)


def _p1_conv3_kernel(x0_ref, x1_ref, x2_ref, w_ref, z_ref, stats_ref):
    # In-kernel im2col for 3x3 stride-1: x{dy}_ref is the dy-shifted padded
    # input row (1, 1, Wp, Cin); the 3 dx taps are static VMEM slices.
    # w_ref: (9, Cin, TC) so per-tap weight slices are leading-dim indexed.
    wo = z_ref.shape[1]
    acc = None
    for dy, x_ref in enumerate((x0_ref, x1_ref, x2_ref)):
        for dx in range(3):
            t = dy * 3 + dx
            xs = x_ref[0, 0, dx:dx + wo, :]                    # (Wo, Cin)
            part = jnp.dot(xs, w_ref[t], preferred_element_type=jnp.float32)
            acc = part if acc is None else acc + part

    @pl.when(pl.program_id(2) == 0)
    def _():
        stats_ref[...] = jnp.zeros(stats_ref.shape, stats_ref.dtype)

    stats_ref[0, 0:1, :] += jnp.sum(acc, axis=0, keepdims=True)
    stats_ref[0, 1:2, :] += jnp.sum(acc * acc, axis=0, keepdims=True)
    z_ref[0] = acc.astype(z_ref.dtype)


# ----------------------------------------------------------------------------
# Path B, pass 2: pure elementwise y = lrelu(z*scale + shift) (+ residual),
# on a lane-dense (rows, Lw >= 128) view.
# ----------------------------------------------------------------------------
def _p2_kernel(z_ref, scale_ref, shift_ref, o_ref):
    y = z_ref[...].astype(jnp.float32) * scale_ref[...] + shift_ref[...]
    y = jnp.where(y >= 0, y, NEG_SLOPE * y)
    o_ref[...] = y.astype(o_ref.dtype)


def _p2_res_kernel(z_ref, scale_ref, shift_ref, r_ref, o_ref):
    y = z_ref[...].astype(jnp.float32) * scale_ref[...] + shift_ref[...]
    y = jnp.where(y >= 0, y, NEG_SLOPE * y)
    o_ref[...] = (r_ref[...].astype(jnp.float32) + y).astype(o_ref.dtype)


# ----------------------------------------------------------------------------
# Glue helpers
# ----------------------------------------------------------------------------
def _im2col(x, k, stride, pad):
    """Small HBM im2col; used only for path A and the five stride-2 downsamples."""
    n, h, w, c = x.shape
    if k == 1 and stride == 1 and pad == 0:
        return x.reshape(n * h * w, c), h, w
    if pad > 0:
        x = jnp.pad(x, ((0, 0), (pad, pad), (pad, pad), (0, 0)))
    ho = (h + 2 * pad - k) // stride + 1
    wo = (w + 2 * pad - k) // stride + 1
    cols = []
    for dy in range(k):
        for dx in range(k):
            cols.append(
                x[:, dy:dy + stride * (ho - 1) + 1:stride,
                     dx:dx + stride * (wo - 1) + 1:stride, :])
    patches = jnp.concatenate(cols, axis=-1)   # (n, ho, wo, k*k*c)
    return patches.reshape(n * ho * wo, k * k * c), ho, wo


def _fused_fits(m, kc, cout, has_res):
    """Per-layer path-A working-set estimate (double-buffered inputs/outputs)."""
    tc = min(cout, 512)
    est = 2 * (m * kc * 2)           # patches
    est += 2 * (kc * tc * 2)         # weights
    est += 2 * (m * tc * 2)          # output
    if has_res:
        est += 2 * (m * tc * 2)
    est += 2 * (m * tc * 4)          # f32 accumulator / temporaries headroom
    est += 1 << 20
    return est <= FUSED_VMEM_BUDGET


def _fused_conv(x, w2d, gamma, beta, k, stride, residual, n):
    pad = k // 2
    patches, ho, wo = _im2col(x, k, stride, pad)
    m, kc = patches.shape
    cout = w2d.shape[1]
    tc = min(cout, 512)
    nc = cout // tc

    in_specs = [
        pl.BlockSpec((m, kc), lambda j: (0, 0)),
        pl.BlockSpec((kc, tc), lambda j: (0, j)),
        pl.BlockSpec((1, tc), lambda j: (0, j)),
        pl.BlockSpec((1, tc), lambda j: (0, j)),
    ]
    args = [patches, w2d, gamma, beta]
    kernel = functools.partial(_fused_kernel, float(m))
    if residual is not None:
        in_specs.append(pl.BlockSpec((m, tc), lambda j: (0, j)))
        args.append(residual.reshape(m, cout))
        kernel = functools.partial(_fused_res_kernel, float(m))

    out = pl.pallas_call(
        kernel,
        out_shape=jax.ShapeDtypeStruct((m, cout), COMPUTE_DTYPE),
        grid=(nc,),
        in_specs=in_specs,
        out_specs=pl.BlockSpec((m, tc), lambda j: (0, j)),
        compiler_params=pltpu.CompilerParams(
            dimension_semantics=("parallel",),
            vmem_limit_bytes=VMEM_LIMIT),
    )(*args)
    return out.reshape(n, ho, wo, cout)


def _pass1(x, w2d, k, stride, cout):
    """Path-B pass 1: matmul + per-channel sum / sum-sq, one image-row per step."""
    n, h, w, cin = x.shape
    pad = k // 2
    ho = (h + 2 * pad - k) // stride + 1
    wo = (w + 2 * pad - k) // stride + 1
    nho = n * ho
    tc = min(cout, 512)
    nc = cout // tc
    # Core-parallel split of the row/stats reduction so both v7x TCs are busy
    # when nc == 1 (harmless on single-core v5e/v6e).
    nsplit = 2 if (nho % 2 == 0 and nho >= 8) else 1
    rps = nho // nsplit

    z_spec = pl.BlockSpec((1, wo, tc), lambda j, p, r: (p * rps + r, 0, j))
    stats_spec = pl.BlockSpec((1, 2, tc), lambda j, p, r: (p, 0, j))
    out_shape = (jax.ShapeDtypeStruct((nho, wo, cout), COMPUTE_DTYPE),
                 jax.ShapeDtypeStruct((nsplit, 2, cout), jnp.float32))

    if k == 3 and stride == 1:
        # In-kernel shifted-window im2col: pad spatially once (border only),
        # pass the padded activation three times with dy-shifted row windows.
        xp = jnp.pad(x, ((0, 0), (1, 1), (1, 1), (0, 0)))
        w3 = w2d.reshape(9, cin, cout)

        def xmap(dy):
            def f(j, p, r):
                g = p * rps + r
                return (g // ho, (g % ho) + dy, 0, 0)
            return f

        in_specs = [pl.BlockSpec((1, 1, w + 2, cin), xmap(dy)) for dy in range(3)]
        in_specs.append(pl.BlockSpec((9, cin, tc), lambda j, p, r: (0, 0, j)))
        args = (xp, xp, xp, w3)
        kernel = _p1_conv3_kernel
    else:
        if k == 1:
            xin = x.reshape(nho, w, cin)                   # ho == h, wo == w
            kc = cin
        else:   # k == 3, stride == 2: small HBM im2col (only 2.25x expansion)
            patches, _, _ = _im2col(x, k, stride, pad)
            kc = k * k * cin
            xin = patches.reshape(nho, wo, kc)
        in_specs = [
            pl.BlockSpec((1, wo, kc), lambda j, p, r: (p * rps + r, 0, 0)),
            pl.BlockSpec((kc, tc), lambda j, p, r: (0, j)),
        ]
        args = (xin, w2d)
        kernel = _p1_matmul_kernel

    z, stats = pl.pallas_call(
        kernel,
        out_shape=out_shape,
        grid=(nc, nsplit, rps),
        in_specs=in_specs,
        out_specs=(z_spec, stats_spec),
        compiler_params=pltpu.CompilerParams(
            dimension_semantics=("parallel", "parallel", "arbitrary"),
            vmem_limit_bytes=VMEM_LIMIT),
    )(*args)
    return z, stats, ho, wo


def _bn_lrelu_apply(z3, stats3, gamma, beta, m, cout, residual=None):
    """Fold stats -> per-channel scale/shift (tiny XLA op), then run the
    elementwise pass-2 kernel on a lane-dense (rows, Lw) view."""
    stats = jnp.sum(stats3.astype(jnp.float32), axis=0)          # (2, cout)
    mean = stats[0] / float(m)
    # Guard the E[x^2]-mean^2 cancellation (stats are f32 sums over large M).
    var = jnp.maximum(stats[1] / float(m) - mean * mean, 0.0)
    inv = jax.lax.rsqrt(var + BN_EPS)
    scale = gamma.reshape(-1) * inv
    shift = beta.reshape(-1) - mean * scale

    lw = cout if cout >= 128 else 128
    if (m * cout) % lw != 0:
        lw = cout
    reps = lw // cout
    scale_l = jnp.tile(scale, reps).reshape(1, lw).astype(jnp.float32)
    shift_l = jnp.tile(shift, reps).reshape(1, lw).astype(jnp.float32)

    rows = (m * cout) // lw
    tr = rows if rows <= P2_TILE_ROWS else P2_TILE_ROWS
    z2 = z3.reshape(rows, lw)

    in_specs = [
        pl.BlockSpec((tr, lw), lambda i: (i, 0)),
        pl.BlockSpec((1, lw), lambda i: (0, 0)),
        pl.BlockSpec((1, lw), lambda i: (0, 0)),
    ]
    args = [z2, scale_l, shift_l]
    kernel = _p2_kernel
    if residual is not None:
        in_specs.append(pl.BlockSpec((tr, lw), lambda i: (i, 0)))
        args.append(residual.reshape(rows, lw))
        kernel = _p2_res_kernel

    out = pl.pallas_call(
        kernel,
        out_shape=jax.ShapeDtypeStruct((rows, lw), COMPUTE_DTYPE),
        grid=(pl.cdiv(rows, tr),),
        in_specs=in_specs,
        out_specs=pl.BlockSpec((tr, lw), lambda i: (i, 0)),
        compiler_params=pltpu.CompilerParams(
            dimension_semantics=("parallel",),
            vmem_limit_bytes=VMEM_LIMIT),
    )(*args)
    return out


def conv_bn_lrelu(x, w2d, gamma, beta, k, stride, residual=None,
                  force_two_pass=False):
    """x: (N,H,W,Cin) bf16 NHWC; w2d: (k*k*Cin, Cout) bf16; gamma/beta: (1,Cout) f32."""
    n, h, w, cin = x.shape
    pad = k // 2
    ho = (h + 2 * pad - k) // stride + 1
    wo = (w + 2 * pad - k) // stride + 1
    m = n * ho * wo
    cout = w2d.shape[1]
    kc = w2d.shape[0]

    if not force_two_pass and _fused_fits(m, kc, cout, residual is not None):
        return _fused_conv(x, w2d, gamma, beta, k, stride, residual, n)

    z, stats, ho, wo = _pass1(x, w2d, k, stride, cout)
    out2 = _bn_lrelu_apply(z, stats, gamma, beta, m, cout, residual)
    return out2.reshape(n, ho, wo, cout)


# ----------------------------------------------------------------------------
# Parameter init (deterministic, synthetic) + static network config
# ----------------------------------------------------------------------------
def _init_cbl(key, cin, cout, k):
    w = jax.random.normal(key, (k, k, cin, cout), jnp.float32)
    w = w * ((cin * k * k) ** -0.5)
    return {
        "w": w.reshape(k * k * cin, cout).astype(COMPUTE_DTYPE),
        "gamma": jnp.ones((1, cout), jnp.float32),   # BN default init
        "beta": jnp.zeros((1, cout), jnp.float32),
    }


def build_darknet53(seed=0):
    keys = list(jax.random.split(jax.random.PRNGKey(seed), 64))
    kit = iter(keys)

    cfg = []      # static: ("cbl", k, stride) or ("res", 0, 0)
    params = []   # arrays only

    def add_cbl(cin, cout, k, stride):
        cfg.append(("cbl", k, stride))
        params.append(_init_cbl(next(kit), cin, cout, k))

    def add_res(c):
        cfg.append(("res", 0, 0))
        params.append({
            "cbl1": _init_cbl(next(kit), c, c // 2, 1),
            "cbl2": _init_cbl(next(kit), c // 2, c, 3),
        })

    def add_multi_residual(cin, cout, count):
        add_cbl(cin, cout, 3, 2)
        for _ in range(count):
            add_res(cout)

    # layerA
    add_cbl(3, 32, 3, 1)
    add_multi_residual(32, 64, 1)
    add_multi_residual(64, 128, 2)
    add_multi_residual(128, 256, 8)
    a_end = len(cfg) - 1
    # layerB
    add_multi_residual(256, 512, 8)
    b_end = len(cfg) - 1
    # layerC
    add_multi_residual(512, 1024, 4)
    c_end = len(cfg) - 1

    return cfg, params, (a_end, b_end, c_end)


CFG, PARAMS, (A_END, B_END, C_END) = build_darknet53(seed=0)


@jax.jit
def darknet53_forward(params, x_nchw):
    x = jnp.transpose(x_nchw, (0, 2, 3, 1)).astype(COMPUTE_DTYPE)  # NCHW -> NHWC bf16
    outs = []
    for i, ((kind, k, stride), p) in enumerate(zip(CFG, params)):
        if kind == "cbl":
            x = conv_bn_lrelu(x, p["w"], p["gamma"], p["beta"], k, stride)
        else:  # Residual: x + CBL3x3(CBL1x1(x)); the +x is fused into the 2nd conv
            h = conv_bn_lrelu(x, p["cbl1"]["w"], p["cbl1"]["gamma"],
                              p["cbl1"]["beta"], 1, 1)
            x = conv_bn_lrelu(h, p["cbl2"]["w"], p["cbl2"]["gamma"],
                              p["cbl2"]["beta"], 3, 1, residual=x)
        if i in (A_END, B_END, C_END):
            outs.append(jnp.transpose(x, (0, 3, 1, 2)).astype(jnp.float32))
    return tuple(outs)


# ----------------------------------------------------------------------------
# Self-test of the two-pass path (path B) against a pure-JAX reference.
# (At the tiny 32x32 network input every layer fits the fused path, so this
#  explicitly exercises the 1x1 / 3x3-s1 / 3x3-s2 two-pass kernels.)
# ----------------------------------------------------------------------------
def _reference_cbl(x_f32, w4d_f32, stride, pad, residual_f32=None):
    z = jax.lax.conv_general_dilated(
        x_f32, w4d_f32, (stride, stride), [(pad, pad), (pad, pad)],
        dimension_numbers=("NHWC", "HWIO", "NHWC"))
    mean = jnp.mean(z, axis=(0, 1, 2))
    var = jnp.mean(z * z, axis=(0, 1, 2)) - mean * mean
    y = (z - mean) * jax.lax.rsqrt(var + BN_EPS)
    y = jnp.where(y >= 0, y, NEG_SLOPE * y)
    if residual_f32 is not None:
        y = residual_f32 + y
    return y


def _self_test_two_pass():
    base = jax.random.PRNGKey(0)
    configs = [
        # (k, stride, cin, cout, H, use_residual)
        (1, 1, 64, 32, 40, False),     # 1x1 two-pass
        (3, 1, 32, 64, 40, True),      # 3x3 stride-1, in-kernel im2col + residual
        (3, 2, 32, 64, 40, False),     # 3x3 stride-2 downsample
    ]
    for idx, (k, s, cin, cout, hh, use_res) in enumerate(configs):
        kx, kw, kr = jax.random.split(jax.random.fold_in(base, idx), 3)
        x = jax.random.normal(kx, (2, hh, hh, cin), jnp.float32).astype(COMPUTE_DTYPE)
        w4 = (jax.random.normal(kw, (k, k, cin, cout), jnp.float32)
              * ((cin * k * k) ** -0.5)).astype(COMPUTE_DTYPE)
        w2d = w4.reshape(k * k * cin, cout)
        gamma = jnp.ones((1, cout), jnp.float32)
        beta = jnp.zeros((1, cout), jnp.float32)
        pad = k // 2
        ho = (hh + 2 * pad - k) // s + 1
        res = None
        if use_res:
            res = jax.random.normal(kr, (2, ho, ho, cout),
                                    jnp.float32).astype(COMPUTE_DTYPE)
        out = conv_bn_lrelu(x, w2d, gamma, beta, k, s, residual=res,
                            force_two_pass=True)
        ref = _reference_cbl(x.astype(jnp.float32), w4.astype(jnp.float32), s, pad,
                             None if res is None else res.astype(jnp.float32))
        out_f = out.astype(jnp.float32)
        assert out_f.shape == ref.shape, (out_f.shape, ref.shape)
        assert bool(jnp.all(jnp.isfinite(out_f)))
        err = float(jnp.max(jnp.abs(out_f - ref)))
        assert err < 0.25, f"two-pass path mismatch (cfg {idx}): max err {err}"


if __name__ == "__main__":
    _self_test_two_pass()

    key = jax.random.PRNGKey(0)
    x = jax.random.normal(key, (2, 3, 32, 32), jnp.float32)  # NCHW, like PyTorch

    out1, out2, out3 = darknet53_forward(PARAMS, x)
    jax.block_until_ready((out1, out2, out3))

    assert out1.shape == (2, 256, 4, 4), out1.shape
    assert out2.shape == (2, 512, 2, 2), out2.shape
    assert out3.shape == (2, 1024, 1, 1), out3.shape
    assert jnp.all(jnp.isfinite(out1)) and jnp.all(jnp.isfinite(out2)) and \
        jnp.all(jnp.isfinite(out3))

    print("KERNEL_OK")
</pallas_src>

<mosaic_0001>
module attributes {stable_mosaic.version = 11 : i64} {
  func.func @_p1_matmul_kernel(%arg0: i32, %arg1: i32, %arg2: i32, %arg3: memref<1x40x64xbf16, #tpu.memory_space<vmem>>, %arg4: memref<64x32xbf16, #tpu.memory_space<vmem>>, %arg5: memref<1x40x32xbf16, #tpu.memory_space<vmem>>, %arg6: memref<1x2x32xf32, #tpu.memory_space<vmem>>) attributes {dimension_semantics = [#tpu.dimension_semantics<parallel>, #tpu.dimension_semantics<parallel>, #tpu.dimension_semantics<arbitrary>], iteration_bounds = array<i64: 1, 2, 40>, scalar_prefetch = 0 : i64, scratch_operands = 0 : i64, tpu.core_type = #tpu.core_type<tc>, window_params = [{transform_indices = @transform_0, window_bounds = array<i64: 1, 40, 64>}, {transform_indices = @transform_1, window_bounds = array<i64: 64, 32>}, {transform_indices = @transform_2, window_bounds = array<i64: 1, 40, 32>}, {transform_indices = @transform_3, window_bounds = array<i64: 1, 2, 32>}]} {
    %c0 = arith.constant 0 : index
    %c0_0 = arith.constant 0 : index
    %c0_1 = arith.constant 0 : index
    %0 = vector.load %arg3[%c0, %c0_0, %c0_1] : memref<1x40x64xbf16, #tpu.memory_space<vmem>>, vector<1x40x64xbf16>
    %1 = vector.shape_cast %0 : vector<1x40x64xbf16> to vector<40x64xbf16>
    %c0_2 = arith.constant 0 : index
    %c0_3 = arith.constant 0 : index
    %2 = vector.load %arg4[%c0_2, %c0_3] : memref<64x32xbf16, #tpu.memory_space<vmem>>, vector<64x32xbf16>
    %cst = arith.constant dense<0.000000e+00> : vector<40x32xf32>
    %3 = tpu.matmul %1, %2, %cst {dimension_numbers = #tpu.dot_dimension_numbers<[1], [0], [0], [1], [0, 0, 1, 1], [], []>} : vector<40x64xbf16>, vector<64x32xbf16>, vector<40x32xf32> -> vector<40x32xf32>
    %c0_i32 = arith.constant 0 : i32
    %4 = arith.cmpi eq, %arg2, %c0_i32 : i32
    %5 = arith.extui %4 : i1 to i32
    %c0_i32_4 = arith.constant 0 : i32
    %6 = arith.cmpi ne, %5, %c0_i32_4 : i32
    scf.if %6 {
      %cst_21 = arith.constant 0.000000e+00 : f32
      %28 = vector.broadcast %cst_21 : f32 to vector<1x2x32xf32>
      %c0_22 = arith.constant 0 : index
      %c0_23 = arith.constant 0 : index
      %c0_24 = arith.constant 0 : index
      %29 = vector.load %arg6[%c0_22, %c0_23, %c0_24] : memref<1x2x32xf32, #tpu.memory_space<vmem>>, vector<1x2x32xf32>
      tpu.vector_store %arg6[%c0_22, %c0_23, %c0_24], %28 {strides = array<i32>} : memref<1x2x32xf32, #tpu.memory_space<vmem>>, vector<1x2x32xf32>,
    } else {
    }
    %c0_5 = arith.constant 0 : index
    %c0_6 = arith.constant 0 : index
    %c0_7 = arith.constant 0 : index
    %7 = vector.load %arg6[%c0_5, %c0_6, %c0_7] : memref<1x2x32xf32, #tpu.memory_space<vmem>>, vector<1x1x32xf32>
    %8 = vector.shape_cast %7 : vector<1x1x32xf32> to vector<1x32xf32>
    %cst_8 = arith.constant dense<0.000000e+00> : vector<32xf32>
    %9 = vector.multi_reduction <add>, %3, %cst_8 [0] : vector<40x32xf32> to vector<32xf32>
    %10 = vector.shape_cast %9 : vector<32xf32> to vector<1x32xf32>
    %11 = arith.addf %8, %10 : vector<1x32xf32>
    %c0_9 = arith.constant 0 : index
    %c0_10 = arith.constant 0 : index
    %c0_11 = arith.constant 0 : index
    %12 = vector.load %arg6[%c0_9, %c0_10, %c0_11] : memref<1x2x32xf32, #tpu.memory_space<vmem>>, vector<1x1x32xf32>
    %13 = vector.shape_cast %12 : vector<1x1x32xf32> to vector<1x32xf32>
    %14 = vector.shape_cast %11 : vector<1x32xf32> to vector<1x1x32xf32>
    tpu.vector_store %arg6[%c0_9, %c0_10, %c0_11], %14 {strides = array<i32>} : memref<1x2x32xf32, #tpu.memory_space<vmem>>, vector<1x1x32xf32>,
    %c0_12 = arith.constant 0 : index
    %c1 = arith.constant 1 : index
    %c0_13 = arith.constant 0 : index
    %15 = vector.load %arg6[%c0_12, %c1, %c0_13] : memref<1x2x32xf32, #tpu.memory_space<vmem>>, vector<1x1x32xf32>
    %16 = vector.shape_cast %15 : vector<1x1x32xf32> to vector<1x32xf32>
    %17 = arith.mulf %3, %3 : vector<40x32xf32>
    %cst_14 = arith.constant dense<0.000000e+00> : vector<32xf32>
    %18 = vector.multi_reduction <add>, %17, %cst_14 [0] : vector<40x32xf32> to vector<32xf32>
    %19 = vector.shape_cast %18 : vector<32xf32> to vector<1x32xf32>
    %20 = arith.addf %16, %19 : vector<1x32xf32>
    %c0_15 = arith.constant 0 : index
    %c1_16 = arith.constant 1 : index
    %c0_17 = arith.constant 0 : index
    %21 = vector.load %arg6[%c0_15, %c1_16, %c0_17] : memref<1x2x32xf32, #tpu.memory_space<vmem>>, vector<1x1x32xf32>
    %22 = vector.shape_cast %21 : vector<1x1x32xf32> to vector<1x32xf32>
    %23 = vector.shape_cast %20 : vector<1x32xf32> to vector<1x1x32xf32>
    tpu.vector_store %arg6[%c0_15, %c1_16, %c0_17], %23 {strides = array<i32>} : memref<1x2x32xf32, #tpu.memory_space<vmem>>, vector<1x1x32xf32>,
    %24 = arith.truncf %3 : vector<40x32xf32> to vector<40x32xbf16>
    %c0_18 = arith.constant 0 : index
    %c0_19 = arith.constant 0 : index
    %c0_20 = arith.constant 0 : index
    %25 = vector.load %arg5[%c0_18, %c0_19, %c0_20] : memref<1x40x32xbf16, #tpu.memory_space<vmem>>, vector<1x40x32xbf16>
    %26 = vector.shape_cast %25 : vector<1x40x32xbf16> to vector<40x32xbf16>
    %27 = vector.shape_cast %24 : vector<40x32xbf16> to vector<1x40x32xbf16>
    tpu.vector_store %arg5[%c0_18, %c0_19, %c0_20], %27 {strides = array<i32>} : memref<1x40x32xbf16, #tpu.memory_space<vmem>>, vector<1x40x32xbf16>,
    return
  }
  func.func @transform_0(%arg0: i32, %arg1: i32, %arg2: i32) -> (i32, i32, i32) {
    %c40_i32 = arith.constant 40 : i32
    %0 = arith.muli %arg1, %c40_i32 : i32
    %1 = arith.addi %0, %arg2 : i32
    %c0_i32 = arith.constant 0 : i32
    %c0_i32_0 = arith.constant 0 : i32
    %c0_i32_1 = arith.constant 0 : i32
    return %1, %c0_i32, %c0_i32_0 : i32, i32, i32
  }
  func.func @transform_1(%arg0: i32, %arg1: i32, %arg2: i32) -> (i32, i32) {
    %c0_i32 = arith.constant 0 : i32
    %c0_i32_0 = arith.constant 0 : i32
    return %c0_i32, %arg0 : i32, i32
  }
  func.func @transform_2(%arg0: i32, %arg1: i32, %arg2: i32) -> (i32, i32, i32) {
    %c40_i32 = arith.constant 40 : i32
    %0 = arith.muli %arg1, %c40_i32 : i32
    %1 = arith.addi %0, %arg2 : i32
    %c0_i32 = arith.constant 0 : i32
    %c0_i32_0 = arith.constant 0 : i32
    return %1, %c0_i32, %arg0 : i32, i32, i32
  }
  func.func @transform_3(%arg0: i32, %arg1: i32, %arg2: i32) -> (i32, i32, i32) {
    %c0_i32 = arith.constant 0 : i32
    %c0_i32_0 = arith.constant 0 : i32
    return %arg1, %c0_i32, %arg0 : i32, i32, i32
  }
}

</mosaic_0001>

<bundles_post_ra>
// kernel: tpu_custom_call.1
= control target key start
LH: loop header
LB: loop body
LE: loop exit
PB: predicated region body
PF: predicated region fallthrough
CT: control target
= control target key end

     0   :  { %9 = vsyncpa [#allocation3], 0  ;;  %s1056_s0 = inlined_call_operand.vmem [shape: bf16[80,40,64], index: 0, kind: input, shape index: {}]   ;;  %s1057_s1 = inlined_call_operand.vmem [shape: bf16[64,32], index: 1, kind: input, shape index: {}]   ;;  %s1058_s2 = inlined_call_operand.vmem [shape: bf16[80,40,32], index: 2, kind: output, shape index: {0}]   ;;  %s1059_s3 = inlined_call_operand.hbm [shape: f32[2,2,32], index: 3, kind: output, shape index: {1}]  }
   0x1   :  { %11 = vsyncpa [#allocation3 + $0x1], 0  ;;  %s873_s12 = smov 0   ;;  %s875_s13 = smov 0  }
   0x2   :  { %s877_s14 = smov 0   ;;  %s879_s15 = smov 0  }
   0x3   :  { %s881_s16 = smov 0   ;;  %s883_s17 = smov 0  }
   0x4   :  { %s885_s18 = smov 0   ;;  %s887_s19 = smov 0  }
   0x5 LB: > { %s602_s20 = sadd.s32 4294967295, %s847_s19   ;;  %s603_s21 = sadd.s32 4294967294, %s847_s19   ;;  %s847_s19 = sphi %s887_s19, %s17_s19   ;;  %s843_s18 = sphi %s885_s18, %s1068_s18   ;;  %s839_s17 = sphi %s883_s17, %s1067_s17   ;;  %s835_s16 = sphi %s881_s16, %s1066_s16   ;;  %s831_s15 = sphi %s879_s15, %s1065_s15   ;;  %s827_s14 = sphi %s877_s14, %s1064_s14   ;;  %s823_s13 = sphi %s875_s13, %s1063_s13   ;;  %s819_s12 = sphi %s873_s12, %s1062_s12  }
   0x6   : > { %s29_s22 = sadd.s32 1, %s839_s17  ;;  %s32_s23 = sadd.s32 1, %s843_s18 }
   0x7   : > { %p30_p0 = scmp.ge.s32.totalorder %s29_s22, 40  ;;  %p143_p1 = scmp.ne.s32.totalorder %s827_s14, %s823_s13 }
   0x8   : > { %p144_p2 = scmp.eq.s32.totalorder %s602_s20, 79  ;;  %p149_p4 = scmp.ne.s32.totalorder %s823_s13, %s819_s12 }
   0x9   : > { %s1070_s22 = smov (%p30_p0, %s29_s22), 0  ;;  %s1072_s23 = smov (!%p30_p0, %s32_s23), %s843_s18 }
   0xa   : > { %p922_p3 = por %p144_p2, %p143_p1  ;;  %p34_p5 = scmp.ge.s32.totalorder %s1072_s23, 2 }
   0xb   : > { %p150_p6 = scmp.eq.s32.totalorder %s603_s21, 79  ;;  %p607_p7 = scmp.ge.s32.totalorder %s847_s19, 1 }
   0xc   : > { %p187_p8 = scmp.lt.s32.totalorder %s847_s19, 81  ;;  %s1074_s23 = smov (%p34_p5, %s1072_s23), 0 }
   0xd   : > { %p932_p9 = por %p150_p6, %p149_p4  ;;  %s128_s26 = ssub.s32 %s843_s18, %s1074_s23 }
   0xe   : > { %p188_p10 = pnand %p607_p7, %p187_p8  ;;  %s133_s27 = sadd.s32 1, %s827_s14 }
   0xf   : > { %p131_p11 = scmp.eq.s32.totalorder %s128_s26, 0  ;;  %v746_v0 = vld [vmem:[%s1057_s1] sm:$0xff] (!%p188_p10)   ;;  %v849_v1 = vmov (!%p188_p10), 0.0   ;;  %s224_s4 = sand.u32 (!%p188_p10), 1, %s823_s13   ;;  %v747_v2 = vld [vmem:[%s1057_s1 + $0x8] sm:$0xff] (!%p188_p10)   ;;  %vm850_vm0 = vmmov (!%p188_p10), 0  }
  0x10   : > { %191 = sbr.rel (%p188_p10) target bundleno = 296 (0x128), region = 28  ;;  %663 = vmatprep.subr.bf16.mxu1 (!%p188_p10), %v849_v1  ;;  %643 = vmatprep.subr.bf16.mxu0 (!%p188_p10), %v849_v1  ;;  %s948_s5 = sshll.u32 (!%p188_p10), %s224_s4, 1  ;;  %v748_v3 = vld [vmem:[%s1057_s1 + $0x10] sm:$0xff] (!%p188_p10)   ;;  %v749_v4 = vld [vmem:[%s1057_s1 + $0x18] sm:$0xff] (!%p188_p10)   ;;  %vm303_vm1 = vcmask (!%p188_p10), 523264  }
  0x11   : > { %s940_s28 = scalar_select %p131_p11, %s827_s14, %s133_s27  }
  0x12   : > { %667 = vmatpush3.bf16.msra.mxu1 (!%p188_p10), %v746_v0  ;;  %644 = vmatpush3.bf16.msra.mxu0 (!%p188_p10), %v746_v0  ;;  %s227_s8 = smul.u32 (!%p188_p10), 40, %s835_s16  ;;  %s973_s9 = scalar_lea.vmem (!%p188_p10), [#allocation2], %s948_s5 }
  0x13   : > { %664 = vmatprep.subr.bf16.mxu1 (!%p188_p10), %v849_v1  ;;  %645 = vmatprep.subr.bf16.mxu0 (!%p188_p10), %v849_v1  ;;  %p621_p13 = scmp.ne.s32.totalorder (!%p188_p10), %s831_s15, 0 }
  0x14   : > { %655 = vmatprep.mubr.msk.bf16.mxu1 (!%p188_p10), %vm850_vm0, %v849_v1  ;;  %651 = vmatprep.mubr.msk.bf16.mxu0 (!%p188_p10), %vm850_vm0, %v849_v1  ;;  %s228_s11 = sadd.s32 (!%p188_p10), %s831_s15, %s227_s8 }
  0x15   : > { %p229_p12 = scmp.lt.s32.totalorder (!%p188_p10), %s228_s11, 79 }
  0x16   : > { %668 = vmatpush3.bf16.msra.mxu1 (!%p188_p10), %v747_v2  ;;  %646 = vmatpush3.bf16.msra.mxu0 (!%p188_p10), %v747_v2 }
  0x17   : > { %665 = vmatprep.subr.bf16.mxu1 %v849_v1  ;;  %647 = vmatprep.subr.bf16.mxu0 %v849_v1  ;;  %s1076_s11 = smov (!%p229_p12, %s228_s11), 79  ;;  %vm373_vm2 = vcmask (!%p621_p13), 254976   ;;  %v851_v20 = vmov (!%p621_p13), 0.0  }
  0x18   : > { %s671_s26 = smul.u32 20, %s1076_s11  ;;  %374 = vst.msk [vmem:[%s973_s9] sm:$0x3] (!%p621_p13), %vm373_vm2, %v851_v20 }
  0x1a   : > { %669 = vmatpush3.bf16.msra.mxu1 %v748_v3  ;;  %648 = vmatpush3.bf16.msra.mxu0 %v748_v3  ;;  %s233_s30 = scalar_lea.vmem %s1056_s0, %s671_s26  ;;  %s969_s8 = scalar_lea.vmem %s1058_s2, %s671_s26 }
  0x1b   : > { %666 = vmatprep.subr.bf16.mxu1 %v849_v1  ;;  %649 = vmatprep.subr.bf16.mxu0 %v849_v1  ;;  %v750_v5 = vld [vmem:[%s233_s30 + $0x8] sm:$0xff]   ;;  %v751_v6 = vld [vmem:[%s233_s30] sm:$0xff]   ;;  %v752_v7 = vld [vmem:[%s233_s30 + $0x10] ss:$0 sps:$4 sm:$0xff]  }
  0x1e   : > { %670 = vmatpush3.bf16.msra.mxu1 %v749_v4  ;;  %650 = vmatpush3.bf16.msra.mxu0 %v749_v4 }
  0x21   : > { %656 = vmatmul.mubr.msk.bf16.vlgmr.msra.gmra.mrb[0].mxu1 %vm303_vm1, %v750_v5  ;;  %652 = vmatmul.mubr.msk.bf16.vlgmr.msra.gmra.mrb[0].mxu0 %vm303_vm1, %v751_v6 }
  0x22   : > { %659 = vmatprep.mubr.msk.bf16.mxu1 %vm850_vm0, %v849_v1 }
  0x29   : > { %660 = vmatmul.mubr.msk.bf16.gmra.mrb[4].mxu1 %vm303_vm1, %v752_v7 }
  0xf4   : > { %v355_v8 = vpop.f32.mrb[0].mxu1  ;;  %v347_v9 = vpop.f32.mrb[0].mxu0 }
  0xf5   : > { %v657_v10 = vpop.f32.mrb[1].mxu1  ;;  %v653_v11 = vpop.f32.mrb[1].mxu0 }
  0xf6   : > { %v358_v12 = vpop.f32.mrb[2].mxu1  ;;  %v350_v13 = vpop.f32.mrb[2].mxu0 }
  0xf7   : > { %v658_v14 = vpop.f32.mrb[3].mxu1  ;;  %v654_v15 = vpop.f32.mrb[3].mxu0 }
  0xf9   : > { %372 = sbr.rel (%p621_p13) target bundleno = 256 (0x100), region = 32 }
  0xfc   : > { %v363_v16 = vpop.f32.mrb[4].mxu1 }
  0xfd   : > { %v661_v17 = vpop.f32.mrb[5].mxu1 }
  0xfe   : > { %v366_v18 = vpop.f32.mrb[6].mxu1 }
  0xff   : > { %v662_v19 = vpop.f32.mrb[7].mxu1 }
 0x100 PF: > { %vm376_vm3 = vcmask 261120   ;;  %v396_v21 = vmul.f32 %v347_v9, %v347_v9  ;;  %v397_v22 = vmul.f32 %v350_v13, %v350_v13  ;;  %v398_v28 = vmul.f32 %v355_v8, %v355_v8  ;;  %v375_v58 = vld [vmem:[%s973_s9] sm:$0x1]  ;;  %v395_v61 = vld [vmem:[%s973_s9 + $0x1] sm:$0x1]  ;;  %s628_s15 = sshll.u32 %s835_s16, 5 }
 0x101   : > { %v377_v23 = vsel %vm376_vm3, %v347_v9, 0.0  ;;  %v378_v24 = vsel %vm376_vm3, %v350_v13, 0.0  ;;  %v380_v25 = vsel %vm376_vm3, %v355_v8, 0.0  ;;  %v382_v27 = vsel %vm376_vm3, %v358_v12, 0.0  ;;  %s475_s5 = sshll.u32 %s973_s9, 4  ;;  %s1000_s20 = scalar_lea.hbm %s1059_s3, %s628_s15  ;;  %s1002_s5 = int_to_ptr.vmem [resolvable:$true] %s475_s5 }
 0x102   : > { %v379_v26 = vadd.f32 %v378_v24, %v377_v23  ;;  %v399_v29 = vmul.f32 %v358_v12, %v358_v12  ;;  %v400_v30 = vmul.f32 %v363_v16, %v363_v16  ;;  %v401_v31 = vsel %vm376_vm3, %v396_v21, 0.0  ;;  %s456_s21 = scalar_lea.sflag [#allocation3], %s224_s4  ;;  %s753_s26 = scalar_lea.vmem %s1002_s5, 32 }
 0x103   : > { %v402_v32 = vsel %vm376_vm3, %v397_v22, 0.0  ;;  %v631_v33 = vpack.c.bf16 %v347_v9, %v347_v9  ;;  %v384_v35 = vsel %vm376_vm3, %v363_v16, 0.0  ;;  %v404_v37 = vsel %vm376_vm3, %v398_v28, 0.0  ;;  %p754_p0 = scmp.ne.s32.totalorder %s1002_s5, %s753_s26  ;;  %s852_s16 = smov [#allocation2]  }
 0x104   : > { %v381_v34 = vadd.f32 %v380_v25, %v379_v26  ;;  %v403_v36 = vadd.f32 %v402_v32, %v401_v31  ;;  %v406_v38 = vsel %vm376_vm3, %v399_v29, 0.0  ;;  %vm439_vm4 = vcmask 257024   ;;  %s757_s27 = sshll.u32 %s852_s16, 4  ;;  %s758_s27 = int_to_ptr.vmem [resolvable:$false] %s757_s27 }
 0x105   : > { %v632_v39 = vpack.c.bf16 %v350_v13, %v350_v13  ;;  %v633_v40 = vpack.c.bf16 %v355_v8, %v355_v8  ;;  %440 = vst.msk [vmem:[%s969_s8] sm:$0xf] %vm439_vm4, %v631_v33  ;;  %v634_v43 = vpack.c.bf16 %v358_v12, %v358_v12  ;;  %v635_v44 = vpack.c.bf16 %v363_v16, %v363_v16  ;;  %p755_p1 = pnand %p754_p0, %p922_p3  ;;  %s759_s29 = scalar_lea.vmem %s758_s27, 64 }
 0x106   : > { %v383_v41 = vadd.f32 %v382_v27, %v381_v34  ;;  %v405_v42 = vadd.f32 %v404_v37, %v403_v36  ;;  %v408_v45 = vsel %vm376_vm3, %v400_v30, 0.0  ;;  %vm393_vm5 = vcmask 253952   ;;  %p760_p4 = scmp.lt.s32.totalorder %s1002_s5, %s758_s27  ;;  %p761_p5 = scmp.lt.s32.totalorder %s759_s29, %s753_s26 }
 0x107   : > { %441 = vst.msk [vmem:[%s969_s8 + $0x4] sm:$0xf] %vm439_vm4, %v632_v39  ;;  %442 = vst.msk [vmem:[%s969_s8 + $0x8] sm:$0xf] %vm439_vm4, %v633_v40  ;;  %p756_p2 = pneg %p755_p1 }
 0x108   : > { %v385_v46 = vadd.f32 %v384_v35, %v383_v41  ;;  %v407_v47 = vadd.f32 %v406_v38, %v405_v42  ;;  %443 = vst.msk [vmem:[%s969_s8 + $0xc] sm:$0xf] %vm439_vm4, %v634_v43  ;;  %444 = vst.msk [vmem:[%s969_s8 + $0x10] sm:$0xf] %vm439_vm4, %v635_v44  ;;  %p762_p6 = por %p761_p5, %p760_p4 }
 0x10a   : > { %v386_v48 = vrot.slane %v385_v46, 4  ;;  %v409_v49 = vadd.f32 %v408_v45, %v407_v47  ;;  %p763_p7 = pnand %p762_p6, %p756_p2 }
 0x10c   : > { %v387_v50 = vadd.f32 %v386_v48, %v385_v46  ;;  %v410_v51 = vrot.slane %v409_v49, 4 }
 0x10e   : > { %v388_v52 = vrot.slane %v387_v50, 2  ;;  %v411_v53 = vadd.f32 %v410_v51, %v409_v49 }
 0x110   : > { %v389_v54 = vadd.f32 %v388_v52, %v387_v50  ;;  %v412_v55 = vrot.slane %v411_v53, 2 }
 0x112   : > { %v390_v56 = vrot.slane %v389_v54, 1  ;;  %v413_v57 = vadd.f32 %v412_v55, %v411_v53 }
 0x114   : > { %v391_v59 = vadd.f32 %v390_v56, %v389_v54  ;;  %v414_v60 = vrot.slane %v413_v57, 1 }
 0x116   : > { %v392_v62 = vadd.f32 %v391_v59, %v375_v58  ;;  %v415_v63 = vadd.f32 %v414_v60, %v413_v57 }
 0x118   : > { %394 = vst.msk [vmem:[%s973_s9] sm:$0x1] %vm393_vm5, %v392_v62  ;;  %v416_v0 = vadd.f32 %v415_v63, %v395_v61 }
 0x11a   : > { %417 = vst.msk [vmem:[%s973_s9 + $0x1] sm:$0x1] %vm393_vm5, %v416_v0 }
 0x11b   : > { %766 = shalt.err (!%p763_p7)
}
 0x11c   : > { %s767_s4 = scalar_lea.hbm %s1000_s20, 32  ;;  %s771_s7 = scalar_lea.hbm %s1059_s3, 64 }
 0x11d   : > { %p768_p8 = scmp.ne.s32.totalorder %s1000_s20, %s767_s4  ;;  %p772_p12 = scmp.lt.u32.totalorder %s1000_s20, %s1059_s3 }
 0x11e   : > { %p773_p13 = scmp.lt.u32.totalorder %s771_s7, %s767_s4  ;;  %p775_p1 = scmp.lt.u32.totalorder %s767_s4, %s1000_s20 }
 0x11f   : > { %p769_p10 = pnand %p768_p8, %p922_p3 }
 0x120   : > { %p774_p0 = por %p773_p13, %p772_p12 }
 0x121   : > { %p770_p11 = pneg %p769_p10 }
 0x122   : > { %p776_p2 = por %p775_p1, %p774_p0 }
 0x124   : > { %p777_p4 = pnand %p776_p2, %p770_p11 }
 0x126   : > { %780 = shalt.err (!%p777_p4)
}
 0x127   : > { %672 = dma.vmem_to_hbm [thread:$0]  (%p922_p3), %s1002_s5, 32, %s1000_s20, %s456_s21  }
 0x128 PF: > { %p678_p5 = scmp.ge.s32.totalorder %s847_s19, 2  ;;  %s500_s15 = sand.u32 1, %s819_s12  }
 0x129   : > { %s501_s10 = scalar_lea.sflag [#allocation3], %s500_s15 }
 0x12a   : > { %p675_p6 = pnand %p678_p5, %p932_p9 }
 0x12c   : > { %814 = dma.done.wait (!%p675_p6), %s501_s10, 32  }
 0x12d   : > { %816 = vsyncadd (!%p675_p6), %s501_s10, 4294967264  ;;  %s17_s19 = sadd.s32 1, %s847_s19   ;;  %s1062_s12 = smov %s823_s13 }
 0x12e   : > { %p14_p7 = scmp.ge.s32.totalorder %s17_s19, 82   ;;  %s1063_s13 = smov %s827_s14 }
 0x12f   : > { %s1064_s14 = smov %s940_s28  ;;  %s1065_s15 = smov %s839_s17 }
 0x130   : > { %s1066_s16 = smov %s843_s18  ;;  %s1067_s17 = smov %s1070_s22 }
 0x131   : > { %s1068_s18 = smov %s1074_s23  ;;  %16 = sbr.rel (!%p14_p7) target bundleno = 5 (0x5), region = 82 }
 0x138   :  { %506 = vsyncpa [#allocation3], 1 }
 0x139   :  { %508 = vsyncpa [#allocation3 + $0x1], 1 }

</bundles_post_ra>
